<compile_context>
chip_gen: v7x
topology: tpu7x:2x2x1
jax: 0.10.0
libtpu: 0.0.40
codegen_flags: <defaults>
</compile_context>

<pallas_src>
import functools

import jax
import jax.numpy as jnp
from jax.experimental import pallas as pl
from jax.experimental.pallas import tpu as pltpu


def _round_up(x, m):
    return ((x + m - 1) // m) * m


def _actor_dense_kernel(x_ref, w1_ref, b1_ref, w2_ref, b2_ref, w3_ref, b3_ref,
                        o_ref, *, max_action, l1_on_vpu):
    x = x_ref[...]          # (tb, S_pad) f32
    w1 = w1_ref[...]        # (S_pad, H1_pad) f32
    b1 = b1_ref[...]        # (1, H1_pad) f32

    if l1_on_vpu:
        # Contraction depth (padded state_dim) is tiny: an MXU pass would be
        # almost entirely padding and pure latency, so build h1 on the VPU as
        # a handful of broadcast rank-1 updates instead.
        h1 = b1
        for k in range(w1.shape[0]):        # static, small (<= 16)
            h1 = h1 + x[:, k:k + 1] * w1[k:k + 1, :]
    else:
        h1 = jnp.dot(x, w1, preferred_element_type=jnp.float32) + b1
    h1 = jnp.maximum(h1, 0.0)

    # Layers 2/3: (bf16) operands on the MXU with f32 accumulation;
    # biases and activations stay in f32 on the VPU/EUP.
    w2 = w2_ref[...]
    h2 = jnp.dot(h1.astype(w2.dtype), w2,
                 preferred_element_type=jnp.float32) + b2_ref[...]
    h2 = jnp.maximum(h2, 0.0)

    w3 = w3_ref[...]
    z = jnp.dot(h2.astype(w3.dtype), w3,
                preferred_element_type=jnp.float32) + b3_ref[...]
    o_ref[...] = (max_action * jax.nn.sigmoid(z)).astype(o_ref.dtype)


def actor_dense_forward(x, w1, b1, w2, b2, w3, b3, max_action,
                        *, matmul_dtype=jnp.bfloat16, tile_b=256):
    """x: (B, state_dim) f32; wN: (in, out); bN: (out,)."""
    B, state_dim = x.shape
    h1_dim = w1.shape[1]
    h2_dim = w2.shape[1]
    action_dim = w3.shape[1]

    # Pad feature dims to lane (128) multiples, state dim to a sublane (8)
    # multiple, batch to the tile size.  Zero padding keeps the math exact.
    s_p = _round_up(state_dim, 8)
    h1_p = _round_up(h1_dim, 128)
    h2_p = _round_up(h2_dim, 128)
    a_p = _round_up(action_dim, 128)

    tb = min(tile_b, _round_up(B, 8))
    b_p = _round_up(B, tb)
    grid = (b_p // tb,)

    f32 = jnp.float32
    x_p = jnp.zeros((b_p, s_p), f32).at[:B, :state_dim].set(x.astype(f32))
    w1_p = jnp.zeros((s_p, h1_p), f32).at[:state_dim, :h1_dim].set(w1.astype(f32))
    b1_p = jnp.zeros((1, h1_p), f32).at[0, :h1_dim].set(b1.astype(f32))
    w2_p = jnp.zeros((h1_p, h2_p), matmul_dtype).at[:h1_dim, :h2_dim].set(
        w2.astype(matmul_dtype))
    b2_p = jnp.zeros((1, h2_p), f32).at[0, :h2_dim].set(b2.astype(f32))
    w3_p = jnp.zeros((h2_p, a_p), matmul_dtype).at[:h2_dim, :action_dim].set(
        w3.astype(matmul_dtype))
    b3_p = jnp.zeros((1, a_p), f32).at[0, :action_dim].set(b3.astype(f32))

    # x / out blocks walk the batch grid axis; weights & biases are resident
    # (constant block index -> fetched once, reused for every batch tile).
    batch_spec = lambda shape: pl.BlockSpec(shape, lambda i: (i, 0))
    resident = lambda arr: pl.BlockSpec(arr.shape, lambda i: (0, 0))

    kernel = functools.partial(_actor_dense_kernel,
                               max_action=float(max_action),
                               l1_on_vpu=(s_p <= 16))

    out = pl.pallas_call(
        kernel,
        out_shape=jax.ShapeDtypeStruct((b_p, a_p), f32),
        grid=grid,
        in_specs=[
            batch_spec((tb, s_p)),
            resident(w1_p), resident(b1_p),
            resident(w2_p), resident(b2_p),
            resident(w3_p), resident(b3_p),
        ],
        out_specs=pl.BlockSpec((tb, a_p), lambda i: (i, 0)),
        compiler_params=pltpu.CompilerParams(
            dimension_semantics=("parallel",)),
    )(x_p, w1_p, b1_p, w2_p, b2_p, w3_p, b3_p)

    return out[:B, :action_dim]


def init_params(key, state_dim, action_dim):
    """Deterministic synthetic init (uniform, roughly matching nn.Linear scale)."""
    def linear(k, fan_in, fan_out):
        kw, kb = jax.random.split(k)
        bound = 1.0 / jnp.sqrt(fan_in)
        w = jax.random.uniform(kw, (fan_in, fan_out), jnp.float32, -bound, bound)
        b = jax.random.uniform(kb, (fan_out,), jnp.float32, -bound, bound)
        return w, b

    k1, k2, k3 = jax.random.split(key, 3)
    w1, b1 = linear(k1, state_dim, 400)
    w2, b2 = linear(k2, 400, 300)
    w3, b3 = linear(k3, 300, action_dim)
    return w1, b1, w2, b2, w3, b3


if __name__ == "__main__":
    # CartPole-like dims: state_dim=4, action_dim=1; small batch.
    batch, state_dim, action_dim = 2, 4, 1
    max_action = 2.0

    key = jax.random.PRNGKey(0)
    kx, kp = jax.random.split(key)
    x = jax.random.normal(kx, (batch, state_dim), jnp.float32)
    params = init_params(kp, state_dim, action_dim)

    def reference(xx):
        w1, b1, w2, b2, w3, b3 = params
        r1 = jnp.maximum(xx @ w1 + b1, 0.0)
        r2 = jnp.maximum(r1 @ w2 + b2, 0.0)
        return max_action * jax.nn.sigmoid(r2 @ w3 + b3)

    out = jax.block_until_ready(actor_dense_forward(x, *params, max_action))
    ref = reference(x)
    assert out.shape == (batch, action_dim)
    # bf16 matmul operands (f32 accumulate) -> slightly looser tolerance vs f32 ref.
    assert jnp.allclose(out, ref, atol=2e-2, rtol=2e-2)

    # Also exercise the multi-tile + padded-tail batch path (grid > 1).
    x2 = jax.random.normal(jax.random.PRNGKey(1), (300, state_dim), jnp.float32)
    out2 = jax.block_until_ready(actor_dense_forward(x2, *params, max_action))
    ref2 = reference(x2)
    assert out2.shape == (300, action_dim)
    assert jnp.allclose(out2, ref2, atol=2e-2, rtol=2e-2)

    print("KERNEL_OK")
</pallas_src>

<mosaic_0001>
module attributes {stable_mosaic.version = 11 : i64} {
  func.func @_actor_dense_kernel(%arg0: i32, %arg1: memref<8x8xf32, #tpu.memory_space<vmem>>, %arg2: memref<8x512xf32, #tpu.memory_space<vmem>>, %arg3: memref<1x512xf32, #tpu.memory_space<vmem>>, %arg4: memref<512x384xbf16, #tpu.memory_space<vmem>>, %arg5: memref<1x384xf32, #tpu.memory_space<vmem>>, %arg6: memref<384x128xbf16, #tpu.memory_space<vmem>>, %arg7: memref<1x128xf32, #tpu.memory_space<vmem>>, %arg8: memref<8x128xf32, #tpu.memory_space<vmem>>) attributes {dimension_semantics = [#tpu.dimension_semantics<parallel>], iteration_bounds = array<i64: 1>, scalar_prefetch = 0 : i64, scratch_operands = 0 : i64, tpu.core_type = #tpu.core_type<tc>, window_params = [{transform_indices = @transform_0, window_bounds = array<i64: 8, 8>}, {pipeline_mode = #tpu.pipeline_mode<synchronous>, transform_indices = @transform_1, window_bounds = array<i64: 8, 512>}, {pipeline_mode = #tpu.pipeline_mode<synchronous>, transform_indices = @transform_2, window_bounds = array<i64: 1, 512>}, {pipeline_mode = #tpu.pipeline_mode<synchronous>, transform_indices = @transform_3, window_bounds = array<i64: 512, 384>}, {pipeline_mode = #tpu.pipeline_mode<synchronous>, transform_indices = @transform_4, window_bounds = array<i64: 1, 384>}, {pipeline_mode = #tpu.pipeline_mode<synchronous>, transform_indices = @transform_5, window_bounds = array<i64: 384, 128>}, {pipeline_mode = #tpu.pipeline_mode<synchronous>, transform_indices = @transform_6, window_bounds = array<i64: 1, 128>}, {transform_indices = @transform_7, window_bounds = array<i64: 8, 128>}]} {
    %c0 = arith.constant 0 : index
    %c0_0 = arith.constant 0 : index
    %0 = vector.load %arg1[%c0, %c0_0] : memref<8x8xf32, #tpu.memory_space<vmem>>, vector<8x8xf32>
    %c0_1 = arith.constant 0 : index
    %c0_2 = arith.constant 0 : index
    %1 = vector.load %arg2[%c0_1, %c0_2] : memref<8x512xf32, #tpu.memory_space<vmem>>, vector<8x512xf32>
    %c0_3 = arith.constant 0 : index
    %c0_4 = arith.constant 0 : index
    %2 = vector.load %arg3[%c0_3, %c0_4] : memref<1x512xf32, #tpu.memory_space<vmem>>, vector<1x512xf32>
    %3 = vector.extract_strided_slice %0 {offsets = [0, 0], sizes = [8, 1], strides = [1, 1]} : vector<8x8xf32> to vector<8x1xf32>
    %4 = vector.extract_strided_slice %1 {offsets = [0, 0], sizes = [1, 512], strides = [1, 1]} : vector<8x512xf32> to vector<1x512xf32>
    %5 = vector.broadcast %3 : vector<8x1xf32> to vector<8x512xf32>
    %6 = vector.broadcast %4 : vector<1x512xf32> to vector<8x512xf32>
    %7 = arith.mulf %5, %6 : vector<8x512xf32>
    %8 = vector.broadcast %2 : vector<1x512xf32> to vector<8x512xf32>
    %9 = arith.addf %8, %7 : vector<8x512xf32>
    %10 = vector.extract_strided_slice %0 {offsets = [0, 1], sizes = [8, 1], strides = [1, 1]} : vector<8x8xf32> to vector<8x1xf32>
    %11 = vector.extract_strided_slice %1 {offsets = [1, 0], sizes = [1, 512], strides = [1, 1]} : vector<8x512xf32> to vector<1x512xf32>
    %12 = vector.broadcast %10 : vector<8x1xf32> to vector<8x512xf32>
    %13 = vector.broadcast %11 : vector<1x512xf32> to vector<8x512xf32>
    %14 = arith.mulf %12, %13 : vector<8x512xf32>
    %15 = arith.addf %9, %14 : vector<8x512xf32>
    %16 = vector.extract_strided_slice %0 {offsets = [0, 2], sizes = [8, 1], strides = [1, 1]} : vector<8x8xf32> to vector<8x1xf32>
    %17 = vector.extract_strided_slice %1 {offsets = [2, 0], sizes = [1, 512], strides = [1, 1]} : vector<8x512xf32> to vector<1x512xf32>
    %18 = vector.broadcast %16 : vector<8x1xf32> to vector<8x512xf32>
    %19 = vector.broadcast %17 : vector<1x512xf32> to vector<8x512xf32>
    %20 = arith.mulf %18, %19 : vector<8x512xf32>
    %21 = arith.addf %15, %20 : vector<8x512xf32>
    %22 = vector.extract_strided_slice %0 {offsets = [0, 3], sizes = [8, 1], strides = [1, 1]} : vector<8x8xf32> to vector<8x1xf32>
    %23 = vector.extract_strided_slice %1 {offsets = [3, 0], sizes = [1, 512], strides = [1, 1]} : vector<8x512xf32> to vector<1x512xf32>
    %24 = vector.broadcast %22 : vector<8x1xf32> to vector<8x512xf32>
    %25 = vector.broadcast %23 : vector<1x512xf32> to vector<8x512xf32>
    %26 = arith.mulf %24, %25 : vector<8x512xf32>
    %27 = arith.addf %21, %26 : vector<8x512xf32>
    %28 = vector.extract_strided_slice %0 {offsets = [0, 4], sizes = [8, 1], strides = [1, 1]} : vector<8x8xf32> to vector<8x1xf32>
    %29 = vector.extract_strided_slice %1 {offsets = [4, 0], sizes = [1, 512], strides = [1, 1]} : vector<8x512xf32> to vector<1x512xf32>
    %30 = vector.broadcast %28 : vector<8x1xf32> to vector<8x512xf32>
    %31 = vector.broadcast %29 : vector<1x512xf32> to vector<8x512xf32>
    %32 = arith.mulf %30, %31 : vector<8x512xf32>
    %33 = arith.addf %27, %32 : vector<8x512xf32>
    %34 = vector.extract_strided_slice %0 {offsets = [0, 5], sizes = [8, 1], strides = [1, 1]} : vector<8x8xf32> to vector<8x1xf32>
    %35 = vector.extract_strided_slice %1 {offsets = [5, 0], sizes = [1, 512], strides = [1, 1]} : vector<8x512xf32> to vector<1x512xf32>
    %36 = vector.broadcast %34 : vector<8x1xf32> to vector<8x512xf32>
    %37 = vector.broadcast %35 : vector<1x512xf32> to vector<8x512xf32>
    %38 = arith.mulf %36, %37 : vector<8x512xf32>
    %39 = arith.addf %33, %38 : vector<8x512xf32>
    %40 = vector.extract_strided_slice %0 {offsets = [0, 6], sizes = [8, 1], strides = [1, 1]} : vector<8x8xf32> to vector<8x1xf32>
    %41 = vector.extract_strided_slice %1 {offsets = [6, 0], sizes = [1, 512], strides = [1, 1]} : vector<8x512xf32> to vector<1x512xf32>
    %42 = vector.broadcast %40 : vector<8x1xf32> to vector<8x512xf32>
    %43 = vector.broadcast %41 : vector<1x512xf32> to vector<8x512xf32>
    %44 = arith.mulf %42, %43 : vector<8x512xf32>
    %45 = arith.addf %39, %44 : vector<8x512xf32>
    %46 = vector.extract_strided_slice %0 {offsets = [0, 7], sizes = [8, 1], strides = [1, 1]} : vector<8x8xf32> to vector<8x1xf32>
    %47 = vector.extract_strided_slice %1 {offsets = [7, 0], sizes = [1, 512], strides = [1, 1]} : vector<8x512xf32> to vector<1x512xf32>
    %48 = vector.broadcast %46 : vector<8x1xf32> to vector<8x512xf32>
    %49 = vector.broadcast %47 : vector<1x512xf32> to vector<8x512xf32>
    %50 = arith.mulf %48, %49 : vector<8x512xf32>
    %51 = arith.addf %45, %50 : vector<8x512xf32>
    %cst = arith.constant 0.000000e+00 : f32
    %52 = vector.broadcast %cst : f32 to vector<8x512xf32>
    %53 = arith.maximumf %51, %52 : vector<8x512xf32>
    %c0_5 = arith.constant 0 : index
    %c0_6 = arith.constant 0 : index
    %54 = vector.load %arg4[%c0_5, %c0_6] : memref<512x384xbf16, #tpu.memory_space<vmem>>, vector<512x384xbf16>
    %55 = arith.truncf %53 : vector<8x512xf32> to vector<8x512xbf16>
    %cst_7 = arith.constant dense<0.000000e+00> : vector<8x384xf32>
    %56 = tpu.matmul %55, %54, %cst_7 {dimension_numbers = #tpu.dot_dimension_numbers<[1], [0], [0], [1], [0, 0, 1, 1], [], []>} : vector<8x512xbf16>, vector<512x384xbf16>, vector<8x384xf32> -> vector<8x384xf32>
    %c0_8 = arith.constant 0 : index
    %c0_9 = arith.constant 0 : index
    %57 = vector.load %arg5[%c0_8, %c0_9] : memref<1x384xf32, #tpu.memory_space<vmem>>, vector<1x384xf32>
    %58 = vector.broadcast %57 : vector<1x384xf32> to vector<8x384xf32>
    %59 = arith.addf %56, %58 : vector<8x384xf32>
    %cst_10 = arith.constant 0.000000e+00 : f32
    %60 = vector.broadcast %cst_10 : f32 to vector<8x384xf32>
    %61 = arith.maximumf %59, %60 : vector<8x384xf32>
    %c0_11 = arith.constant 0 : index
    %c0_12 = arith.constant 0 : index
    %62 = vector.load %arg6[%c0_11, %c0_12] : memref<384x128xbf16, #tpu.memory_space<vmem>>, vector<384x128xbf16>
    %63 = arith.truncf %61 : vector<8x384xf32> to vector<8x384xbf16>
    %cst_13 = arith.constant dense<0.000000e+00> : vector<8x128xf32>
    %64 = tpu.matmul %63, %62, %cst_13 {dimension_numbers = #tpu.dot_dimension_numbers<[1], [0], [0], [1], [0, 0, 1, 1], [], []>} : vector<8x384xbf16>, vector<384x128xbf16>, vector<8x128xf32> -> vector<8x128xf32>
    %c0_14 = arith.constant 0 : index
    %c0_15 = arith.constant 0 : index
    %65 = vector.load %arg7[%c0_14, %c0_15] : memref<1x128xf32, #tpu.memory_space<vmem>>, vector<1x128xf32>
    %66 = vector.broadcast %65 : vector<1x128xf32> to vector<8x128xf32>
    %67 = arith.addf %64, %66 : vector<8x128xf32>
    %68 = arith.negf %67 : vector<8x128xf32>
    %69 = math.exp %68 : vector<8x128xf32>
    %cst_16 = arith.constant 1.000000e+00 : f32
    %70 = vector.broadcast %cst_16 : f32 to vector<8x128xf32>
    %71 = arith.addf %70, %69 : vector<8x128xf32>
    %72 = arith.divf %70, %71 : vector<8x128xf32>
    %cst_17 = arith.constant 2.000000e+00 : f32
    %73 = vector.broadcast %cst_17 : f32 to vector<8x128xf32>
    %74 = arith.mulf %73, %72 : vector<8x128xf32>
    %c0_18 = arith.constant 0 : index
    %c0_19 = arith.constant 0 : index
    %75 = vector.load %arg8[%c0_18, %c0_19] : memref<8x128xf32, #tpu.memory_space<vmem>>, vector<8x128xf32>
    tpu.vector_store %arg8[%c0_18, %c0_19], %74 {strides = array<i32>} : memref<8x128xf32, #tpu.memory_space<vmem>>, vector<8x128xf32>,
    return
  }
  func.func @transform_0(%arg0: i32) -> (i32, i32) {
    %c0_i32 = arith.constant 0 : i32
    %c0_i32_0 = arith.constant 0 : i32
    return %arg0, %c0_i32 : i32, i32
  }
  func.func @transform_1(%arg0: i32) -> (i32, i32) {
    %c0_i32 = arith.constant 0 : i32
    %c0_i32_0 = arith.constant 0 : i32
    %c0_i32_1 = arith.constant 0 : i32
    return %c0_i32, %c0_i32_0 : i32, i32
  }
  func.func @transform_2(%arg0: i32) -> (i32, i32) {
    %c0_i32 = arith.constant 0 : i32
    %c0_i32_0 = arith.constant 0 : i32
    %c0_i32_1 = arith.constant 0 : i32
    return %c0_i32, %c0_i32_0 : i32, i32
  }
  func.func @transform_3(%arg0: i32) -> (i32, i32) {
    %c0_i32 = arith.constant 0 : i32
    %c0_i32_0 = arith.constant 0 : i32
    %c0_i32_1 = arith.constant 0 : i32
    return %c0_i32, %c0_i32_0 : i32, i32
  }
  func.func @transform_4(%arg0: i32) -> (i32, i32) {
    %c0_i32 = arith.constant 0 : i32
    %c0_i32_0 = arith.constant 0 : i32
    %c0_i32_1 = arith.constant 0 : i32
    return %c0_i32, %c0_i32_0 : i32, i32
  }
  func.func @transform_5(%arg0: i32) -> (i32, i32) {
    %c0_i32 = arith.constant 0 : i32
    %c0_i32_0 = arith.constant 0 : i32
    %c0_i32_1 = arith.constant 0 : i32
    return %c0_i32, %c0_i32_0 : i32, i32
  }
  func.func @transform_6(%arg0: i32) -> (i32, i32) {
    %c0_i32 = arith.constant 0 : i32
    %c0_i32_0 = arith.constant 0 : i32
    %c0_i32_1 = arith.constant 0 : i32
    return %c0_i32, %c0_i32_0 : i32, i32
  }
  func.func @transform_7(%arg0: i32) -> (i32, i32) {
    %c0_i32 = arith.constant 0 : i32
    %c0_i32_0 = arith.constant 0 : i32
    return %arg0, %c0_i32 : i32, i32
  }
}

</mosaic_0001>

<bundles_post_ra>
// kernel: tpu_custom_call.1
= control target key start
LH: loop header
LB: loop body
LE: loop exit
PB: predicated region body
PF: predicated region fallthrough
CT: control target
= control target key end

     0   :  { %12 = vsyncpa [#allocation3], 0  ;;  %s2270_s0 = inlined_call_operand.hbm [shape: f32[8,8], index: 0, kind: input, shape index: {}]   ;;  %s2271_s1 = inlined_call_operand.hbm [shape: f32[8,512], index: 1, kind: input, shape index: {}]   ;;  %s2272_s2 = inlined_call_operand.vmem [shape: f32[1,512], index: 2, kind: input, shape index: {}]   ;;  %s2273_s3 = inlined_call_operand.hbm [shape: bf16[512,384], index: 3, kind: input, shape index: {}]   ;;  %s2274_s4 = inlined_call_operand.vmem [shape: f32[1,384], index: 4, kind: input, shape index: {}]   ;;  %s2275_s5 = inlined_call_operand.hbm [shape: bf16[384,128], index: 5, kind: input, shape index: {}]   ;;  %s2276_s6 = inlined_call_operand.vmem [shape: f32[1,128], index: 6, kind: input, shape index: {}]   ;;  %s2277_s7 = inlined_call_operand.hbm [shape: f32[8,128], index: 7, kind: output, shape index: {}]  }
   0x1   :  { %13 = vsyncpa [#allocation6], 0 }
   0x2   :  { %14 = vsyncpa [#allocation9], 0 }
   0x3   :  { %15 = vsyncpa [#allocation4], 0  ;;  %s1993_s24 = smov [#allocation5]   ;;  %s1994_s26 = smov [#allocation2]  }
   0x4   :  { %s32_s25 = sshll.u32 %s1993_s24, 4  ;;  %s22_s27 = sshll.u32 %s1994_s26, 4  ;;  %s33_s25 = int_to_ptr.vmem [resolvable:$true] %s32_s25  ;;  %s23_s27 = int_to_ptr.vmem [resolvable:$true] %s22_s27 }
   0x5   :  { %s1875_s30 = scalar_lea.hbm %s2271_s1, 512 }
   0x6   :  { %p1876_p0 = scmp.ne.s32.totalorder %s2271_s1, %s1875_s30  ;;  %p1879_p1 = scmp.lt.u32.totalorder %s1875_s30, %s2271_s1 }
   0x8   :  { %p1881_p2 = pnand %p1879_p1, %p1876_p0 }
   0xa   :  { %1884 = shalt.err (!%p1881_p2)
}
   0xb   :  { %s1885_s12 = scalar_lea.vmem %s33_s25, 512  ;;  %p1890_p4 = scmp.lt.s32.totalorder %s33_s25, %s33_s25 }
   0xc   :  { %p1886_p3 = scmp.ne.s32.totalorder %s33_s25, %s1885_s12  ;;  %p1891_p5 = scmp.lt.s32.totalorder %s1885_s12, %s1885_s12 }
   0xe   :  { %p1892_p6 = por %p1891_p5, %p1890_p4 }
  0x10   :  { %p1893_p7 = pnand %p1892_p6, %p1886_p3 }
  0x12   :  { %1896 = shalt.err (!%p1893_p7)
}
  0x13   :  { %35 = dma.hbm_to_vmem [thread:$0]  %s2271_s1, 512, %s33_s25, [#allocation6]  }
  0x14   :  { %s1897_s17 = scalar_lea.hbm %s2270_s0, 128 }
  0x15   :  { %p1898_p8 = scmp.ne.s32.totalorder %s2270_s0, %s1897_s17  ;;  %p1901_p9 = scmp.lt.u32.totalorder %s1897_s17, %s2270_s0 }
  0x17   :  { %p1903_p10 = pnand %p1901_p9, %p1898_p8 }
  0x19   :  { %1906 = shalt.err (!%p1903_p10)
}
  0x1a   :  { %s1907_s22 = scalar_lea.vmem %s23_s27, 128  ;;  %p1912_p12 = scmp.lt.s32.totalorder %s23_s27, %s23_s27 }
  0x1b   :  { %p1908_p11 = scmp.ne.s32.totalorder %s23_s27, %s1907_s22  ;;  %p1913_p13 = scmp.lt.s32.totalorder %s1907_s22, %s1907_s22 }
  0x1d   :  { %p1914_p0 = por %p1913_p13, %p1912_p12 }
  0x1f   :  { %p1915_p1 = pnand %p1914_p0, %p1908_p11 }
  0x21   :  { %1918 = shalt.err (!%p1915_p1)
}
  0x22   :  { %25 = dma.hbm_to_vmem [thread:$0]  %s2270_s0, 128, %s23_s27, [#allocation3]  }
  0x23   :  { %s1995_s24 = smov [#allocation7]   ;;  %s1919_s29 = scalar_lea.hbm %s2273_s3, 12288 }
  0x24   :  { %s43_s25 = sshll.u32 %s1995_s24, 4  ;;  %p1920_p2 = scmp.ne.s32.totalorder %s2273_s3, %s1919_s29  ;;  %s44_s25 = int_to_ptr.vmem [resolvable:$true] %s43_s25 }
  0x25   :  { %p1923_p3 = scmp.lt.u32.totalorder %s1919_s29, %s2273_s3 }
  0x27   :  { %p1925_p4 = pnand %p1923_p3, %p1920_p2 }
  0x29   :  { %1928 = shalt.err (!%p1925_p4)
}
  0x2a   :  { %s1929_s11 = scalar_lea.vmem %s44_s25, 12288  ;;  %p1934_p6 = scmp.lt.s32.totalorder %s44_s25, %s44_s25 }
  0x2b   :  { %p1930_p5 = scmp.ne.s32.totalorder %s44_s25, %s1929_s11  ;;  %p1935_p7 = scmp.lt.s32.totalorder %s1929_s11, %s1929_s11 }
  0x2d   :  { %p1936_p8 = por %p1935_p7, %p1934_p6 }
  0x2f   :  { %p1937_p9 = pnand %p1936_p8, %p1930_p5 }
  0x31   :  { %1940 = shalt.err (!%p1937_p9)
}
  0x32   :  { %s1996_s0 = smov 192   ;;  %s1997_s27 = smov 12  }
  0x33   :  { %49 = dma.hbm_to_vmem [thread:$0]  %s2273_s3, 12288, %s44_s25, [#allocation6], %s1996_s0, %s1996_s0, %s1997_s27  }
  0x34   :  { %s1998_s14 = smov [#allocation8]   ;;  %s1941_s18 = scalar_lea.hbm %s2275_s5, 3072 }
  0x35   :  { %s57_s15 = sshll.u32 %s1998_s14, 4  ;;  %p1942_p10 = scmp.ne.s32.totalorder %s2275_s5, %s1941_s18  ;;  %s58_s15 = int_to_ptr.vmem [resolvable:$true] %s57_s15 }
  0x36   :  { %p1945_p11 = scmp.lt.u32.totalorder %s1941_s18, %s2275_s5 }
  0x38   :  { %p1947_p12 = pnand %p1945_p11, %p1942_p10 }
  0x3a   :  { %1950 = shalt.err (!%p1947_p12)
}
  0x3b   :  { %s1951_s1 = scalar_lea.vmem %s58_s15, 3072  ;;  %p1956_p0 = scmp.lt.s32.totalorder %s58_s15, %s58_s15 }
  0x3c   :  { %p1952_p13 = scmp.ne.s32.totalorder %s58_s15, %s1951_s1  ;;  %p1957_p1 = scmp.lt.s32.totalorder %s1951_s1, %s1951_s1 }
  0x3e   :  { %p1958_p2 = por %p1957_p1, %p1956_p0 }
  0x40   :  { %p1959_p3 = pnand %p1958_p2, %p1952_p13 }
  0x42   :  { %1962 = shalt.err (!%p1959_p3)
}
  0x43   :  { %s1999_s3 = smov 64   ;;  %s2000_s23 = smov 4  }
  0x44   :  { %63 = dma.hbm_to_vmem [thread:$0]  %s2275_s5, 3072, %s58_s15, [#allocation9], %s1999_s3, %s1999_s3, %s2000_s23  }
  0x45   :  { %1985 = dma.done.wait [#allocation3], 128  }
  0x46   :  { %1986 = vsyncadd [#allocation3], 4294967168 }
  0x47   :  { %1987 = dma.done.wait [#allocation6], 12800  }
  0x48   :  { %1988 = vsyncadd [#allocation6], 4294954496 }
  0x49   :  { %1989 = dma.done.wait [#allocation9], 3072  }
  0x4a   :  { %1990 = vsyncadd [#allocation9], 4294964224  ;;  %v2001_v0 = vmov 2   ;;  %v2002_v1 = vmov 0   ;;  %v79_v2 = vld [vmem:[#allocation2] sm:$0xff]  ;;  %v2003_v7 = vmov 3   ;;  %v90_v59 = vlaneseq }
  0x4b   :  { %1712 = vset.pattern.permute.xlu1 %v2001_v0  ;;  %1710 = vset.pattern.permute.xlu0 %v2002_v1  ;;  %v1719_v3 = vld [vmem:[#allocation7 + $0x4] ss:$12 sps:$4 sm:$0xff]   ;;  %v1721_v4 = vld [vmem:[#allocation7] ss:$12 sps:$4 sm:$0xff]   ;;  %v1722_v5 = vld [vmem:[#allocation7 + $0x1c] ss:$12 sps:$4 sm:$0xff]  }
  0x4c   :  { %164 = vperm.xlu1 %1712, %v79_v2   ;;  %87 = vperm.xlu0 %1710, %v79_v2   ;;  %v1724_v6 = vld [vmem:[#allocation7 + $0x18] ss:$12 sps:$4 sm:$0xff]   ;;  %v2004_v8 = vmov 1   ;;  %v1725_v9 = vld [vmem:[#allocation7 + $0x34] ss:$12 sps:$4 sm:$0xff]   ;;  %v2005_v12 = vmov 4  }
  0x4d   :  { %996 = vmatprep.subr.bf16.mxu0 %v1719_v3  ;;  %v1727_v10 = vld [vmem:[#allocation7 + $0x30] ss:$12 sps:$4 sm:$0xff]   ;;  %v1728_v11 = vld [vmem:[#allocation7 + $0x4c] ss:$12 sps:$4 sm:$0xff]   ;;  %v2006_v13 = vmov 5   ;;  %v2007_v18 = vmov 6  }
  0x4e   :  { %997 = vmatpush1.bf16.msra.mxu0 %v1721_v4  ;;  %v1730_v14 = vld [vmem:[#allocation7 + $0x48] ss:$12 sps:$4 sm:$0xff]   ;;  %v1731_v16 = vld [vmem:[#allocation7 + $0x64] ss:$12 sps:$4 sm:$0xff]   ;;  %v1733_v19 = vld [vmem:[#allocation7 + $0x60] ss:$12 sps:$4 sm:$0xff]  }
  0x4f   :  { %998 = vmatprep.subr.bf16.mxu0 %v1722_v5  ;;  %v1745_v15 = vld [vmem:[#allocation7 + $0xc8] ss:$12 sps:$4 sm:$0xff]   ;;  %v1750_v21 = vld [vmem:[#allocation7 + $0xe0] ss:$12 sps:$4 sm:$0xff]   ;;  %v2008_v22 = vmov 7   ;;  %v91_v60 = vshrl.u32 %v90_v59, 7 }
  0x50   :  { %1713 = vset.pattern.permute.xlu1 %v2003_v7  ;;  %1711 = vset.pattern.permute.xlu0 %v2004_v8  ;;  %v1747_v17 = vld [vmem:[#allocation7 + $0x8] ss:$12 sps:$4 sm:$0xff]   ;;  %v1752_v23 = vld [vmem:[#allocation7 + $0x20] ss:$12 sps:$4 sm:$0xff]   ;;  %v1736_v24 = vld [vmem:[#allocation7 + $0x78] ss:$12 sps:$4 sm:$0xff]  }
  0x51   :  { %192 = vperm.xlu1 %1713, %v79_v2   ;;  %136 = vperm.xlu0 %1711, %v79_v2   ;;  %v1734_v20 = vld [vmem:[#allocation7 + $0x7c] ss:$12 sps:$4 sm:$0xff]   ;;  %v1737_v25 = vld [vmem:[#allocation7 + $0x94] ss:$12 sps:$4 sm:$0xff]   ;;  %v1755_v26 = vld [vmem:[#allocation7 + $0xf8] ss:$12 sps:$4 sm:$0xff]  }
  0x52   :  { %999 = vmatpush1.bf16.msra.mxu0 %v1724_v6  ;;  %1590 = vmatprep.subr.bf16.mxu1 %v1745_v15  ;;  %v1757_v27 = vld [vmem:[#allocation7 + $0x38] ss:$12 sps:$4 sm:$0xff]   ;;  %v1739_v28 = vld [vmem:[#allocation7 + $0x90] ss:$12 sps:$4 sm:$0xff]   ;;  %v1765_v32 = vld [vmem:[#allocation7 + $0x128] ss:$12 sps:$4 sm:$0xff]  }
  0x53   :  { %1000 = vmatprep.subr.bf16.mxu0 %v1725_v9  ;;  %1591 = vmatpush3.bf16.msra.mxu1 %v1747_v17  ;;  %v1760_v29 = vld [vmem:[#allocation7 + $0x110] ss:$12 sps:$4 sm:$0xff]   ;;  %v1740_v30 = vld [vmem:[#allocation7 + $0xac] ss:$12 sps:$4 sm:$0xff]   ;;  %v1742_v33 = vld [vmem:[#allocation7 + $0xa8] ss:$12 sps:$4 sm:$0xff]  }
  0x54   :  { %1592 = vmatprep.subr.bf16.mxu1 %v1750_v21  ;;  %v1762_v31 = vld [vmem:[#allocation7 + $0x50] ss:$12 sps:$4 sm:$0xff]   ;;  %v1767_v35 = vld [vmem:[#allocation7 + $0x68] ss:$12 sps:$4 sm:$0xff]   ;;  %v1770_v36 = vld [vmem:[#allocation7 + $0x140] ss:$12 sps:$4 sm:$0xff]  }
  0x55   :  { %1714 = vset.pattern.permute.xlu1 %v2005_v12  ;;  %1715 = vset.pattern.permute.xlu0 %v2006_v13  ;;  %v1743_v34 = vld [vmem:[#allocation7 + $0xc4] ss:$12 sps:$4 sm:$0xff]   ;;  %v1746_v37 = vld [vmem:[#allocation7 + $0xc0] ss:$12 sps:$4 sm:$0xff]   ;;  %v1748_v38 = vld [vmem:[#allocation7 + $0xdc] ss:$12 sps:$4 sm:$0xff]  }
  0x56   :  { %220 = vperm.xlu1 %1714, %v79_v2   ;;  %248 = vperm.xlu0 %1715, %v79_v2   ;;  %v1772_v39 = vld [vmem:[#allocation7 + $0x80] ss:$12 sps:$4 sm:$0xff]   ;;  %v1775_v40 = vld [vmem:[#allocation7 + $0x158] ss:$12 sps:$4 sm:$0xff]   ;;  %v1780_v44 = vld [vmem:[#allocation7 + $0x170] ss:$12 sps:$4 sm:$0xff]  }
  0x57   :  { %1001 = vmatpush1.bf16.msra.mxu0 %v1727_v10  ;;  %1593 = vmatpush3.bf16.msra.mxu1 %v1752_v23  ;;  %v1751_v41 = vld [vmem:[#allocation7 + $0xd8] ss:$12 sps:$4 sm:$0xff]   ;;  %v1753_v42 = vld [vmem:[#allocation7 + $0xf4] ss:$12 sps:$4 sm:$0xff]   ;;  %v1756_v45 = vld [vmem:[#allocation7 + $0xf0] ss:$12 sps:$4 sm:$0xff]  }
  0x58   :  { %1002 = vmatprep.subr.bf16.mxu0 %v1728_v11  ;;  %1594 = vmatprep.subr.bf16.mxu1 %v1755_v26  ;;  %v1777_v43 = vld [vmem:[#allocation7 + $0x98] ss:$12 sps:$4 sm:$0xff]   ;;  %v1782_v47 = vld [vmem:[#allocation7 + $0xb0] ss:$12 sps:$4 sm:$0xff]   ;;  %v1786_v48 = vld [vmem:[#allocation7 + $0x248] ss:$12 sps:$4 sm:$0xff]  }
  0x59   :  { %v1758_v46 = vld [vmem:[#allocation7 + $0x10c] ss:$12 sps:$4 sm:$0xff]   ;;  %v1761_v49 = vld [vmem:[#allocation7 + $0x108] ss:$12 sps:$4 sm:$0xff]   ;;  %v1763_v50 = vld [vmem:[#allocation7 + $0x124] ss:$12 sps:$4 sm:$0xff]  }
  0x5a   :  { %1716 = vset.pattern.permute.xlu1 %v2007_v18  ;;  %1718 = vset.pattern.permute.xlu0 %v2008_v22  ;;  %v1766_v51 = vld [vmem:[#allocation7 + $0x120] ss:$12 sps:$4 sm:$0xff]   ;;  %v1768_v52 = vld [vmem:[#allocation7 + $0x13c] ss:$12 sps:$4 sm:$0xff]   ;;  %v1771_v53 = vld [vmem:[#allocation7 + $0x138] ss:$12 sps:$4 sm:$0xff]  }
  0x5b   :  { %276 = vperm.xlu1 %1716, %v79_v2   ;;  %1003 = vmatpush1.bf16.msra.mxu0 %v1730_v14  ;;  %v1773_v54 = vld [vmem:[#allocation7 + $0x154] ss:$12 sps:$4 sm:$0xff]   ;;  %v1776_v55 = vld [vmem:[#allocation7 + $0x150] ss:$12 sps:$4 sm:$0xff]   ;;  %v1778_v56 = vld [vmem:[#allocation7 + $0x16c] ss:$12 sps:$4 sm:$0xff]  }
  0x5c   :  { %1004 = vmatprep.subr.bf16.mxu0 %v1731_v16  ;;  %1595 = vmatpush3.bf16.msra.mxu1 %v1757_v27  ;;  %v1781_v57 = vld [vmem:[#allocation7 + $0x168] ss:$12 sps:$4 sm:$0xff]   ;;  %v1785_v58 = vld [vmem:[#allocation7 + $0x184] ss:$12 sps:$4 sm:$0xff]   ;;  %v2100_v61 = vsub.s32 0, %v91_v60  ;;  %v2106_v0 = vld [vmem:[#allocation5 + $0x18] sm:$0xff] }
  0x5d   :  { %1596 = vmatprep.subr.bf16.mxu1 %v1760_v29  ;;  %v2102_v62 = vld [vmem:[#allocation5] sm:$0xff]  ;;  %v2104_v63 = vld [vmem:[#allocation5 + $0x8] sm:$0xff]  ;;  %v2108_v1 = vsub.s32 1, %v91_v60  ;;  %v2115_v3 = vld [vmem:[%s2272_s2] sm:$0xf]  ;;  %v2123_v7 = vsub.s32 2, %v91_v60 }
  0x5e   :  { %v93_v4 = vrot.slane %v2102_v62, %v2100_v61  ;;  %v97_v5 = vrot.slane %v2104_v63, %v2100_v61  ;;  %v105_v6 = vrot.slane %v2106_v0, %v2100_v61  ;;  %v114_v10 = vrot.slane %v2115_v3, %v2100_v61  ;;  %s2011_s30 = smov [#allocation10]  }
  0x5f   :  { %1717 = vset.pattern.permute.xlu1 %v2008_v22  ;;  %1005 = vmatpush1.bf16.msra.mxu0 %v1733_v19  ;;  %v118_v11 = vrot.slane %v2115_v3, %v2108_v1  ;;  %v2135_v13 = vsub.s32 4, %v91_v60  ;;  %v2140_v17 = vsub.s32 5, %v91_v60  ;;  %v142_v18 = vrot.slane %v2102_v62, %v2108_v1  ;;  %s1457_s8 = sshll.u32 %s2011_s30, 4  ;;  %s1458_s8 = int_to_ptr.vmem [resolvable:$true] %s1457_s8 }
  0x60   :  { %304 = vperm.xlu1 %1717, %v79_v2   ;;  %1006 = vmatprep.subr.bf16.mxu0 %v1734_v20  ;;  %v2110_v2 = vsub.s32 3, %v91_v60  ;;  %v146_v19 = vrot.slane %v2104_v63, %v2108_v1  ;;  %v154_v20 = vrot.slane %v2106_v0, %v2108_v1  ;;  %v2148_v21 = vsub.s32 6, %v91_v60  ;;  %s1963_s9 = scalar_lea.vmem %s1458_s8, 128  ;;  %p1968_p5 = scmp.lt.s32.totalorder %s1458_s8, %s1458_s8 }
  0x61   :  { %1597 = vmatpush3.bf16.msra.mxu1 %v1762_v31  ;;  %v170_v22 = vrot.slane %v2102_v62, %v2123_v7  ;;  %v174_v23 = vrot.slane %v2104_v63, %v2123_v7  ;;  %vm2010_vm0 = vmmov 0   ;;  %p1964_p4 = scmp.ne.s32.totalorder %s1458_s8, %s1963_s9  ;;  %p1969_p6 = scmp.lt.s32.totalorder %s1963_s9, %s1963_s9 }
  0x62   :  { %1598 = vmatprep.subr.bf16.mxu1 %v1765_v32  ;;  %v126_v12 = vrot.slane %v2115_v3, %v2110_v2  ;;  %v202_v29 = vrot.slane %v2104_v63, %v2110_v2  ;;  %v210_v32 = vrot.slane %v2106_v0, %v2110_v2 }
  0x63   :  { %1007 = vmatpush1.bf16.msra.mxu0 %v1736_v24  ;;  %v182_v24 = vrot.slane %v2106_v0, %v2123_v7  ;;  %p1970_p7 = por %p1969_p6, %p1968_p5 }
  0x64   :  { %1008 = vmatprep.subr.bf16.mxu0 %v1737_v25  ;;  %v198_v25 = vrot.slane %v2102_v62, %v2110_v2 }
  0x65   :  { %1599 = vmatpush3.bf16.msra.mxu1 %v1767_v35  ;;  %v238_v35 = vrot.slane %v2106_v0, %v2135_v13  ;;  %p1971_p8 = pnand %p1970_p7, %p1964_p4 }
  0x66   :  { %1600 = vmatprep.subr.bf16.mxu1 %v1770_v36 }
  0x67   :  { %1009 = vmatpush1.bf16.msra.mxu0 %v1739_v28 }
  0x68   :  { %1010 = vmatprep.subr.bf16.mxu0 %v1740_v30 }
  0x69   :  { %1601 = vmatpush3.bf16.msra.mxu1 %v1772_v39  ;;  %v254_v39 = vrot.slane %v2102_v62, %v2140_v17 }
  0x6a   :  { %1602 = vmatprep.subr.bf16.mxu1 %v1775_v40 }
  0x6b   :  { %1011 = vmatpush1.bf16.msra.mxu0 %v1742_v33  ;;  %v226_v33 = vrot.slane %v2102_v62, %v2135_v13 }
  0x6c   :  { %1012 = vmatprep.subr.bf16.mxu0 %v1743_v34  ;;  %v230_v34 = vrot.slane %v2104_v63, %v2135_v13 }
  0x6d   :  { %1603 = vmatpush3.bf16.msra.mxu1 %v1777_v43  ;;  %v266_v43 = vrot.slane %v2106_v0, %v2140_v17 }
  0x6e   :  { %1604 = vmatprep.subr.bf16.mxu1 %v1780_v44 }
  0x6f   :  { %1013 = vmatpush1.bf16.msra.mxu0 %v1746_v37 }
  0x70   :  { %1014 = vmatprep.subr.bf16.mxu0 %v1748_v38 }
  0x71   :  { %1605 = vmatpush3.bf16.msra.mxu1 %v1782_v47 }
  0x72   :  { %1612 = vmatprep.subr.bf16.mxu1 %v1786_v48 }
  0x73   :  { %1015 = vmatpush1.bf16.msra.mxu0 %v1751_v41 }
  0x74   :  { %1016 = vmatprep.subr.bf16.mxu0 %v1753_v42  ;;  %v258_v42 = vrot.slane %v2104_v63, %v2140_v17 }
  0x77   :  { %1017 = vmatpush1.bf16.msra.mxu0 %v1756_v45 }
  0x78   :  { %1018 = vmatprep.subr.bf16.mxu0 %v1758_v46 }
  0x7b   :  { %1019 = vmatpush1.bf16.msra.mxu0 %v1761_v49 }
  0x7c   :  { %1020 = vmatprep.subr.bf16.mxu0 %v1763_v50 }
  0x7f   :  { %1021 = vmatpush1.bf16.msra.mxu0 %v1766_v51  ;;  %v282_v51 = vrot.slane %v2102_v62, %v2148_v21 }
  0x80   :  { %1022 = vmatprep.subr.bf16.mxu0 %v1768_v52  ;;  %v2190_v52 = vsub.s32 7, %v91_v60 }
  0x83   :  { %1023 = vmatpush1.bf16.msra.mxu0 %v1771_v53 }
  0x84   :  { %1024 = vmatprep.subr.bf16.mxu0 %v1773_v54 }
  0x87   :  { %1025 = vmatpush1.bf16.msra.mxu0 %v1776_v55 }
  0x88   :  { %1026 = vmatprep.subr.bf16.mxu0 %v1778_v56 }
  0x8b   :  { %1027 = vmatpush1.bf16.msra.mxu0 %v1781_v57 }
  0x8c   :  { %1037 = vmatprep.subr.bf16.mxu0 %v1785_v58 }
  0xcb   :  { %v2125_v8 = vpop.permute.xlu1 %164  ;;  %v2127_v9 = vpop.permute.xlu0 %87 }
  0xcc   :  { %v106_v14 = vmul.f32 %v93_v4, %v2127_v9  ;;  %v107_v15 = vmul.f32 %v97_v5, %v2127_v9  ;;  %v109_v16 = vmul.f32 %v105_v6, %v2127_v9  ;;  %v183_v40 = vmul.f32 %v170_v22, %v2125_v8 }
  0xcd   :  { %v184_v41 = vmul.f32 %v174_v23, %v2125_v8  ;;  %v186_v44 = vmul.f32 %v182_v24, %v2125_v8  ;;  %v286_v5 = vrot.slane %v2104_v63, %v2148_v21  ;;  %v310_v22 = vrot.slane %v2102_v62, %v2190_v52 }
  0xce   :  { %v131_v26 = vadd.f32 %v114_v10, %v106_v14  ;;  %v132_v27 = vadd.f32 %v118_v11, %v107_v15  ;;  %v134_v28 = vadd.f32 %v126_v12, %v109_v16  ;;  %v294_v11 = vrot.slane %v2106_v0, %v2148_v21 }
  0xd0   :  { %v2160_v30 = vpop.permute.xlu1 %192  ;;  %v2162_v31 = vpop.permute.xlu0 %136 }
  0xd1   :  { %v155_v36 = vmul.f32 %v142_v18, %v2162_v31  ;;  %v156_v37 = vmul.f32 %v146_v19, %v2162_v31  ;;  %v158_v38 = vmul.f32 %v154_v20, %v2162_v31  ;;  %v211_v48 = vmul.f32 %v198_v25, %v2160_v30 }
  0xd2   :  { %v212_v49 = vmul.f32 %v202_v29, %v2160_v30  ;;  %v214_v53 = vmul.f32 %v210_v32, %v2160_v30  ;;  %v314_v25 = vrot.slane %v2104_v63, %v2190_v52 }
  0xd3   :  { %v159_v45 = vadd.f32 %v155_v36, %v131_v26  ;;  %v160_v46 = vadd.f32 %v156_v37, %v132_v27  ;;  %v162_v47 = vadd.f32 %v158_v38, %v134_v28  ;;  %v322_v26 = vrot.slane %v2106_v0, %v2190_v52  ;;  %v2215_v27 = vld [vmem:[#allocation5 + $0x10] sm:$0xff] }
  0xd4   :  { %v101_v62 = vrot.slane %v2215_v27, %v2100_v61 }
  0xd5   :  { %v2186_v50 = vpop.permute.xlu1 %220  ;;  %v187_v54 = vadd.f32 %v183_v40, %v159_v45  ;;  %v188_v55 = vadd.f32 %v184_v41, %v160_v46  ;;  %v190_v56 = vadd.f32 %v186_v44, %v162_v47  ;;  %v2193_v57 = vpop.permute.xlu0 %248  ;;  %v150_v41 = vrot.slane %v2215_v27, %v2108_v1 }
  0xd6   :  { %v239_v58 = vmul.f32 %v226_v33, %v2186_v50  ;;  %v240_v59 = vmul.f32 %v230_v34, %v2186_v50  ;;  %v242_v4 = vmul.f32 %v238_v35, %v2186_v50  ;;  %v267_v12 = vmul.f32 %v254_v39, %v2193_v57 }
  0xd7   :  { %v215_v6 = vadd.f32 %v211_v48, %v187_v54  ;;  %v216_v10 = vadd.f32 %v212_v49, %v188_v55  ;;  %v218_v60 = vadd.f32 %v214_v53, %v190_v56  ;;  %v268_v14 = vmul.f32 %v258_v42, %v2193_v57  ;;  %v1783_v53 = vld [vmem:[#allocation7 + $0x180] ss:$12 sps:$4 sm:$0xff]   ;;  %v1787_v55 = vld [vmem:[#allocation7 + $0x188] ss:$12 sps:$4 sm:$0xff]  }
  0xd8   :  { %v270_v15 = vmul.f32 %v266_v43, %v2193_v57  ;;  %v122_v39 = vrot.slane %v2115_v3, %v2123_v7  ;;  %v108_v40 = vmul.f32 %v101_v62, %v2127_v9  ;;  %v157_v48 = vmul.f32 %v150_v41, %v2162_v31  ;;  %v1790_v9 = vld [vmem:[#allocation7 + $0x19c] ss:$12 sps:$4 sm:$0xff]   ;;  %v1791_v56 = vld [vmem:[#allocation7 + $0x260] ss:$12 sps:$4 sm:$0xff]  }
  0xd9   :  { %v243_v16 = vadd.f32 %v239_v58, %v215_v6  ;;  %v244_v18 = vadd.f32 %v240_v59, %v216_v10  ;;  %v246_v19 = vadd.f32 %v242_v4, %v218_v60  ;;  %v178_v3 = vrot.slane %v2215_v27, %v2123_v7  ;;  %v1788_v4 = vld [vmem:[#allocation7 + $0x198] ss:$12 sps:$4 sm:$0xff]   ;;  %v1792_v31 = vld [vmem:[#allocation7 + $0x1a0] ss:$12 sps:$4 sm:$0xff]   ;;  %v1822_v41 = vld [vmem:[#allocation7 + $0x230] ss:$12 sps:$4 sm:$0xff]  }
  0xda   :  { %v2205_v20 = vpop.permute.xlu1 %276  ;;  %v133_v47 = vadd.f32 %v122_v39, %v108_v40  ;;  %v206_v6 = vrot.slane %v2215_v27, %v2110_v2  ;;  %v1795_v10 = vld [vmem:[#allocation7 + $0x1b4] ss:$12 sps:$4 sm:$0xff]   ;;  %v1796_v60 = vld [vmem:[#allocation7 + $0x278] ss:$12 sps:$4 sm:$0xff]   ;;  %v1801_v2 = vld [vmem:[#allocation7 + $0x290] ss:$12 sps:$4 sm:$0xff]  }
  0xdb   :  { %v295_v23 = vmul.f32 %v282_v51, %v2205_v20  ;;  %v296_v24 = vmul.f32 %v286_v5, %v2205_v20  ;;  %v271_v28 = vadd.f32 %v267_v12, %v243_v16  ;;  %v272_v29 = vadd.f32 %v268_v14, %v244_v18  ;;  %v1793_v14 = vld [vmem:[#allocation7 + $0x1b0] ss:$12 sps:$4 sm:$0xff]   ;;  %v1820_v39 = vld [vmem:[#allocation7 + $0x22c] ss:$12 sps:$4 sm:$0xff]   ;;  %v1818_v40 = vld [vmem:[#allocation7 + $0x228] ss:$12 sps:$4 sm:$0xff]  }
  0xdc   :  { %v274_v32 = vadd.f32 %v270_v15, %v246_v19  ;;  %v298_v33 = vmul.f32 %v294_v11, %v2205_v20  ;;  %v161_v58 = vadd.f32 %v157_v48, %v133_v47  ;;  %v185_v5 = vmul.f32 %v178_v3, %v2125_v8  ;;  %v1797_v15 = vld [vmem:[#allocation7 + $0x1b8] ss:$12 sps:$4 sm:$0xff]   ;;  %v1831_v47 = vld [vmem:[#allocation7 + $0x274] ss:$12 sps:$4 sm:$0xff]   ;;  %v1829_v48 = vld [vmem:[#allocation7 + $0x270] ss:$12 sps:$4 sm:$0xff]  }
  0xdd   :  { %v300_v35 = vadd.f32 %v296_v24, %v272_v29  ;;  %v299_v36 = vadd.f32 %v295_v23, %v271_v28  ;;  %v234_v12 = vrot.slane %v2215_v27, %v2135_v13  ;;  %v213_v16 = vmul.f32 %v206_v6, %v2160_v30  ;;  %v1800_v8 = vld [vmem:[#allocation7 + $0x1cc] ss:$12 sps:$4 sm:$0xff]   ;;  %v1798_v23 = vld [vmem:[#allocation7 + $0x1c8] ss:$12 sps:$4 sm:$0xff]   ;;  %v1802_v13 = vld [vmem:[#allocation7 + $0x1d0] ss:$12 sps:$4 sm:$0xff]  }
  0xde   :  { %v302_v38 = vadd.f32 %v298_v33, %v274_v32  ;;  %v189_v11 = vadd.f32 %v185_v5, %v161_v58  ;;  %v1805_v24 = vld [vmem:[#allocation7 + $0x1e4] ss:$12 sps:$4 sm:$0xff]   ;;  %v290_v28 = vrot.slane %v2215_v27, %v2148_v21  ;;  %v1807_v29 = vld [vmem:[#allocation7 + $0x1e8] ss:$12 sps:$4 sm:$0xff]   ;;  %v1811_v33 = vld [vmem:[#allocation7 + $0x2c0] ss:$12 sps:$4 sm:$0xff]  }
  0xdf   :  { %v2220_v34 = vpop.permute.xlu1 %304  ;;  %v241_v18 = vmul.f32 %v234_v12, %v2186_v50  ;;  %v1803_v50 = vld [vmem:[#allocation7 + $0x1e0] ss:$12 sps:$4 sm:$0xff]   ;;  %v1810_v32 = vld [vmem:[#allocation7 + $0x1fc] ss:$12 sps:$4 sm:$0xff]   ;;  %v1838_v3 = vld [vmem:[#allocation7 + $0x2b8] ss:$12 sps:$4 sm:$0xff]  }
  0xe0   :  { %v323_v37 = vmul.f32 %v310_v22, %v2220_v34  ;;  %v324_v63 = vmul.f32 %v314_v25, %v2220_v34  ;;  %v326_v0 = vmul.f32 %v322_v26, %v2220_v34  ;;  %v217_v19 = vadd.f32 %v213_v16, %v189_v11  ;;  %v1806_v25 = vld [vmem:[#allocation7 + $0x2a8] ss:$12 sps:$4 sm:$0xff]   ;;  %v1846_v58 = vld [vmem:[#allocation7 + $0x2ec] ss:$12 sps:$4 sm:$0xff]  }
  0xe1   :  { %v262_v22 = vrot.slane %v2215_v27, %v2140_v17  ;;  %v318_v17 = vrot.slane %v2215_v27, %v2190_v52  ;;  %v1813_v52 = vld [vmem:[#allocation7 + $0x210] ss:$12 sps:$4 sm:$0xff]   ;;  %v1817_v27 = vld [vmem:[#allocation7 + $0x218] ss:$12 sps:$4 sm:$0xff]   ;;  %v1849_v5 = vld [vmem:[#allocation8 + $0x48] sm:$0xff]  }
  0xe2   :  { %v328_v42 = vadd.f32 %v324_v63, %v300_v35  ;;  %v327_v43 = vadd.f32 %v323_v37, %v299_v36  ;;  %v330_v44 = vadd.f32 %v326_v0, %v302_v38  ;;  %v245_v26 = vadd.f32 %v241_v18, %v217_v19  ;;  %v1812_v36 = vld [vmem:[#allocation7 + $0x200] ss:$12 sps:$4 sm:$0xff]   ;;  %v1816_v63 = vld [vmem:[#allocation7 + $0x2d8] ss:$12 sps:$4 sm:$0xff]   ;;  %v1860_v18 = vld [vmem:[#allocation8 + $0x30] sm:$0xff]  }
  0xe3   :  { %v269_v30 = vmul.f32 %v262_v22, %v2193_v57  ;;  %v297_v35 = vmul.f32 %v290_v28, %v2205_v20  ;;  %v1808_v57 = vld [vmem:[#allocation7 + $0x1f8] ss:$12 sps:$4 sm:$0xff]   ;;  %v325_v21 = vmul.f32 %v318_v17, %v2220_v34  ;;  %v1815_v37 = vld [vmem:[#allocation7 + $0x214] ss:$12 sps:$4 sm:$0xff]   ;;  %v1821_v20 = vld [vmem:[#allocation7 + $0x2f0] ss:$12 sps:$4 sm:$0xff]  }
  0xe4   :  { %v332_v45 = vmax.f32 %v328_v42, 0.0  ;;  %v331_v46 = vmax.f32 %v327_v43, 0.0  ;;  %v334_v49 = vmax.f32 %v330_v44, 0.0  ;;  %v1825_v34 = vld [vmem:[#allocation7 + $0x244] ss:$12 sps:$4 sm:$0xff]   ;;  %v1850_v6 = vld [vmem:[#allocation8 + $0x8] sm:$0xff]  }
  0xe5   :  { %v273_v62 = vadd.f32 %v269_v30, %v245_v26  ;;  %v1823_v43 = vld [vmem:[#allocation7 + $0x240] ss:$12 sps:$4 sm:$0xff]   ;;  %v1853_v11 = vld [vmem:[#allocation8 + $0x58] sm:$0xff]  }
  0xe6   :  { %v464_v51 = vpack.c.bf16 %v332_v45, %v332_v45  ;;  %v463_v54 = vpack.c.bf16 %v331_v46, %v331_v46  ;;  %v466_v59 = vpack.c.bf16 %v334_v49, %v334_v49  ;;  %v1828_v45 = vld [vmem:[#allocation7 + $0x25c] ss:$12 sps:$4 sm:$0xff]   ;;  %v1826_v46 = vld [vmem:[#allocation7 + $0x258] ss:$12 sps:$4 sm:$0xff]  }
  0xe7   :  { %v301_v0 = vadd.f32 %v297_v35, %v273_v62  ;;  %v1834_v49 = vld [vmem:[#allocation7 + $0x28c] ss:$12 sps:$4 sm:$0xff]  }
  0xe8   :  { %1028 = vmatprep.mubr.bf16.mxu0 %v464_v51  ;;  %1110 = vmatprep.mubr.bf16.mxu1 %v464_v51  ;;  %v1832_v51 = vld [vmem:[#allocation7 + $0x288] ss:$12 sps:$4 sm:$0xff]   ;;  %v1854_v12 = vld [vmem:[#allocation8 + $0x18] sm:$0xff]  }
  0xe9   :  { %1029 = vmatmul.mubr.bf16.vlgmr.msra.gmra.mrb[0].mxu0 %v463_v54  ;;  %1111 = vmatmul.mubr.bf16.vlgmr.msra.gmra.mrb[0].mxu1 %v463_v54  ;;  %v329_v38 = vadd.f32 %v325_v21, %v301_v0  ;;  %v1835_v54 = vld [vmem:[#allocation7 + $0x2a0] ss:$12 sps:$4 sm:$0xff]   ;;  %v1861_v19 = vld [vmem:[#allocation8 + $0x78] sm:$0xff]  }
  0xea   :  { %1038 = vmatpush1.bf16.msra.mxu0 %v1783_v53  ;;  %1613 = vmatpush3.bf16.msra.mxu1 %v1787_v55  ;;  %v1837_v53 = vld [vmem:[#allocation7 + $0x2a4] ss:$12 sps:$4 sm:$0xff]   ;;  %v1840_v55 = vld [vmem:[#allocation7 + $0x2bc] ss:$12 sps:$4 sm:$0xff]   ;;  %v467_v28 = vld [vmem:[%s2274_s4] sm:$0x7] }
  0xeb   :  { %1069 = vmatprep.mubr.bf16.mxu0 %v466_v59  ;;  %1150 = vmatprep.mubr.bf16.mxu1 %v466_v59  ;;  %v333_v42 = vmax.f32 %v329_v38, 0.0  ;;  %v1844_v59 = vld [vmem:[#allocation7 + $0x2e8] ss:$12 sps:$4 sm:$0xff]   ;;  %v1862_v22 = vld [vmem:[#allocation8 + $0x38] sm:$0xff]   ;;  %v476_v21 = vrot.slane %v467_v28, %v2108_v1 }
  0xec   :  { %1039 = vmatprep.subr.bf16.mxu0 %v1790_v9  ;;  %1614 = vmatprep.subr.bf16.mxu1 %v1791_v56  ;;  %v1843_v9 = vld [vmem:[#allocation7 + $0x2d4] ss:$12 sps:$4 sm:$0xff]   ;;  %v1841_v56 = vld [vmem:[#allocation7 + $0x2d0] ss:$12 sps:$4 sm:$0xff]   ;;  %v1857_v16 = vld [vmem:[#allocation8 + $0x68] sm:$0xff]  }
  0xed   :  { %v465_v44 = vpack.c.bf16 %v333_v42, %v333_v42  ;;  %v1864_v42 = vld [vmem:[#allocation8 + $0x88] sm:$0xff]   ;;  %v1866_v1 = vld [vmem:[#allocation8 + $0x98] sm:$0xff]  }
  0xee   :  { %1040 = vmatpush1.bf16.msra.mxu0 %v1788_v4  ;;  %1615 = vmatpush3.bf16.msra.mxu1 %v1792_v31  ;;  %v1847_v4 = vld [vmem:[#allocation8 + $0x40] sm:$0xff]  }
  0xef   :  { %1041 = vmatprep.subr.bf16.mxu0 %v1795_v10  ;;  %1616 = vmatprep.subr.bf16.mxu1 %v1796_v60  ;;  %v1848_v31 = vld [vmem:[#allocation8] sm:$0xff]   ;;  %v1851_v10 = vld [vmem:[#allocation8 + $0x50] sm:$0xff]  }
  0xf0   :  { %v1852_v60 = vld [vmem:[#allocation8 + $0x10] sm:$0xff]  }
  0xf2   :  { %1042 = vmatpush1.bf16.msra.mxu0 %v1793_v14  ;;  %1617 = vmatpush3.bf16.msra.mxu1 %v1797_v15  ;;  %v1855_v14 = vld [vmem:[#allocation8 + $0x60] sm:$0xff]  }
  0xf3   :  { %1043 = vmatprep.subr.bf16.mxu0 %v1800_v8  ;;  %1618 = vmatprep.subr.bf16.mxu1 %v1801_v2  ;;  %v1856_v15 = vld [vmem:[#allocation8 + $0x20] sm:$0xff]   ;;  %v1858_v8 = vld [vmem:[#allocation8 + $0x28] sm:$0xff]   ;;  %v1859_v2 = vld [vmem:[#allocation8 + $0x70] sm:$0xff]  }
  0xf6   :  { %1044 = vmatpush1.bf16.msra.mxu0 %v1798_v23  ;;  %1619 = vmatpush3.bf16.msra.mxu1 %v1802_v13  ;;  %v2009_v23 = vmov 0.0  }
  0xf7   :  { %1045 = vmatprep.subr.bf16.mxu0 %v1805_v24  ;;  %1620 = vmatprep.subr.bf16.mxu1 %v1806_v25 }
  0xfa   :  { %1046 = vmatpush1.bf16.msra.mxu0 %v1803_v50  ;;  %1621 = vmatpush3.bf16.msra.mxu1 %v1807_v29  ;;  %v480_v50 = vrot.slane %v467_v28, %v2123_v7 }
  0xfb   :  { %1047 = vmatprep.subr.bf16.mxu0 %v1810_v32  ;;  %1622 = vmatprep.subr.bf16.mxu1 %v1811_v33 }
  0xfe   :  { %1048 = vmatpush1.bf16.msra.mxu0 %v1808_v57  ;;  %1623 = vmatpush3.bf16.msra.mxu1 %v1812_v36  ;;  %v472_v36 = vrot.slane %v467_v28, %v2100_v61  ;;  %v1865_v61 = vld [vmem:[#allocation8 + $0x90] sm:$0xff]  }
  0xff   :  { %1049 = vmatprep.subr.bf16.mxu0 %v1815_v37  ;;  %1624 = vmatprep.subr.bf16.mxu1 %v1816_v63 }
 0x102   :  { %1050 = vmatpush1.bf16.msra.mxu0 %v1813_v52  ;;  %1625 = vmatpush3.bf16.msra.mxu1 %v1817_v27 }
 0x103   :  { %1051 = vmatprep.subr.bf16.mxu0 %v1820_v39  ;;  %1626 = vmatprep.subr.bf16.mxu1 %v1821_v20 }
 0x106   :  { %1052 = vmatpush1.bf16.msra.mxu0 %v1818_v40  ;;  %1627 = vmatpush3.bf16.msra.mxu1 %v1822_v41  ;;  %v1863_v40 = vld [vmem:[#allocation8 + $0x80] sm:$0xff]  }
 0x107   :  { %1053 = vmatprep.subr.bf16.mxu0 %v1825_v34  ;;  %1634 = vmatprep.subr.bf16.mxu1 %v1847_v4  ;;  %v1867_v34 = vld [vmem:[#allocation8 + $0xa0] sm:$0xff]  }
 0x109   :  { %1151 = vmatmul.mubr.bf16.vlgmr.msra.gmra.mrb[4].mxu1 %v465_v44 }
 0x10a   :  { %1054 = vmatpush1.bf16.msra.mxu0 %v1823_v43  ;;  %1635 = vmatpush3.bf16.msra.mxu1 %v1848_v31  ;;  %v1868_v43 = vld [vmem:[#allocation8 + $0xa8] sm:$0xff]  }
 0x10b   :  { %1055 = vmatprep.subr.bf16.mxu0 %v1828_v45  ;;  %1636 = vmatprep.subr.bf16.mxu1 %v1849_v5  ;;  %v1870_v45 = vld [vmem:[#allocation8 + $0xb8] sm:$0xff]  }
 0x10e   :  { %1056 = vmatpush1.bf16.msra.mxu0 %v1826_v46  ;;  %1637 = vmatpush3.bf16.msra.mxu1 %v1850_v6 }
 0x10f   :  { %1057 = vmatprep.subr.bf16.mxu0 %v1831_v47  ;;  %1638 = vmatprep.subr.bf16.mxu1 %v1851_v10 }
 0x112   :  { %1058 = vmatpush1.bf16.msra.mxu0 %v1829_v48  ;;  %1639 = vmatpush3.bf16.msra.mxu1 %v1852_v60 }
 0x113   :  { %1059 = vmatprep.subr.bf16.mxu0 %v1834_v49  ;;  %1640 = vmatprep.subr.bf16.mxu1 %v1853_v11 }
 0x116   :  { %1060 = vmatpush1.bf16.msra.mxu0 %v1832_v51  ;;  %1641 = vmatpush3.bf16.msra.mxu1 %v1854_v12 }
 0x117   :  { %1061 = vmatprep.subr.bf16.mxu0 %v1837_v53  ;;  %1642 = vmatprep.subr.bf16.mxu1 %v1855_v14 }
 0x11a   :  { %1062 = vmatpush1.bf16.msra.mxu0 %v1835_v54  ;;  %1643 = vmatpush3.bf16.msra.mxu1 %v1856_v15 }
 0x11b   :  { %1063 = vmatprep.subr.bf16.mxu0 %v1840_v55  ;;  %1644 = vmatprep.subr.bf16.mxu1 %v1857_v16  ;;  %v1564_v55 = vld [vmem:[%s2276_s6] ss:$0 sm:$0xff] }
 0x11e   :  { %1064 = vmatpush1.bf16.msra.mxu0 %v1838_v3  ;;  %1645 = vmatpush3.bf16.msra.mxu1 %v1858_v8 }
 0x11f   :  { %1065 = vmatprep.subr.bf16.mxu0 %v1843_v9  ;;  %1646 = vmatprep.subr.bf16.mxu1 %v1859_v2 }
 0x122   :  { %1066 = vmatpush1.bf16.msra.mxu0 %v1841_v56  ;;  %1647 = vmatpush3.bf16.msra.mxu1 %v1860_v18 }
 0x123   :  { %1067 = vmatprep.subr.bf16.mxu0 %v1846_v58  ;;  %1648 = vmatprep.subr.bf16.mxu1 %v1861_v19 }
 0x126   :  { %1068 = vmatpush1.bf16.msra.mxu0 %v1844_v59  ;;  %1649 = vmatpush3.bf16.msra.mxu1 %v1862_v22 }
 0x127   :  { %1665 = vmatprep.subr.bf16.mxu1 %v2009_v23 }
 0x129   :  { %1070 = vmatmul.mubr.bf16.vlgmr.msra.gmra.mrb[0].mxu0 %v465_v44  ;;  %v1869_v44 = vld [vmem:[#allocation8 + $0xb0] sm:$0xff]  }
 0x1bc   :  { %v1606_v13 = vpop.f32.mrb[0].mxu1 }
 0x1bd   :  { %v1607_v24 = vpop.f32.mrb[1].mxu1 }
 0x1be   :  { %v1608_v25 = vadd.f32 %v1607_v24, %v1606_v13  ;;  %v1609_v26 = vpop.f32.mrb[2].mxu1 }
 0x1bf   :  { %v1610_v30 = vpop.f32.mrb[3].mxu1 }
 0x1c0   :  { %v1113_v32 = vadd.f32 %v1608_v25, %v480_v50 }
 0x1dc   :  { %v1628_v29 = vpop.f32.mrb[4].mxu1 }
 0x1dd   :  { %v1629_v17 = vpop.f32.mrb[5].mxu1 }
 0x1de   :  { %v1630_v33 = vadd.f32 %v1629_v17, %v1628_v29  ;;  %v1631_v62 = vpop.f32.mrb[6].mxu1 }
 0x1df   :  { %v1632_v35 = vpop.f32.mrb[7].mxu1 }
 0x1e0   :  { %v1153_v57 = vadd.f32 %v1630_v33, %v1113_v32 }
 0x1e2   :  { %v1160_v46 = vmax.f32 %v1153_v57, 0.0 }
 0x1e4   :  { %v1211_v47 = vpack.c.bf16 %v1160_v46, %v1160_v46 }
 0x1fc   :  { %v1071_v37 = vpop.f32.mrb[0].mxu0 }
 0x1fd   :  { %v1685_v63 = vadd.f32 %v1071_v37, %v472_v36  ;;  %v1073_v0 = vpop.f32.mrb[1].mxu0 }
 0x1fe   :  { %v1686_v52 = vadd.f32 %v1073_v0, %v476_v21  ;;  %v1075_v27 = vpop.f32.mrb[2].mxu0 }
 0x1ff   :  { %v1158_v38 = vmax.f32 %v1685_v63, 0.0  ;;  %v1076_v39 = vpop.f32.mrb[3].mxu0 }
 0x200   :  { %v1159_v20 = vmax.f32 %v1686_v52, 0.0 }
 0x201   :  { %v1209_v41 = vpack.c.bf16 %v1158_v38, %v1158_v38 }
 0x202   :  { %v1210_v7 = vpack.c.bf16 %v1159_v20, %v1159_v20 }
 0x204   :  { %1395 = vmatprep.mubr.bf16.mxu1 %v1210_v7 }
 0x205   :  { %1396 = vmatmul.mubr.bf16.vlgmr.msra.gmra.mrb[8].mxu1 %v1209_v41 }
 0x206   :  { %1666 = vmatpush3.bf16.msra.mxu1 %v1863_v40  ;;  %1681 = vmatprep.mubr.msk.bf16.mxu1 %vm2010_vm0, %v2009_v23 }
 0x207   :  { %1667 = vmatprep.subr.bf16.mxu1 %v2009_v23 }
 0x20a   :  { %1668 = vmatpush3.bf16.msra.mxu1 %v1864_v42 }
 0x20b   :  { %1669 = vmatprep.subr.bf16.mxu1 %v2009_v23 }
 0x20e   :  { %1670 = vmatpush3.bf16.msra.mxu1 %v1865_v61 }
 0x20f   :  { %1671 = vmatprep.subr.bf16.mxu1 %v2009_v23 }
 0x212   :  { %1672 = vmatpush3.bf16.msra.mxu1 %v1866_v1 }
 0x213   :  { %1673 = vmatprep.subr.bf16.mxu1 %v2009_v23 }
 0x216   :  { %1674 = vmatpush3.bf16.msra.mxu1 %v1867_v34 }
 0x217   :  { %1675 = vmatprep.subr.bf16.mxu1 %v2009_v23 }
 0x21a   :  { %1676 = vmatpush3.bf16.msra.mxu1 %v1868_v43 }
 0x21b   :  { %1677 = vmatprep.subr.bf16.mxu1 %v2009_v23 }
 0x21e   :  { %1678 = vmatpush3.bf16.msra.mxu1 %v1869_v44 }
 0x21f   :  { %1679 = vmatprep.subr.bf16.mxu1 %v2009_v23 }
 0x222   :  { %1680 = vmatpush3.bf16.msra.mxu1 %v1870_v45 }
 0x225   :  { %1682 = vmatmul.mubr.bf16.vlgmr.msra.gmra.mrb[12].mxu1 %v1211_v47 }
 0x2d8   :  { %v1650_v48 = vpop.f32.mrb[8].mxu1 }
 0x2d9   :  { %v1651_v49 = vpop.f32.mrb[9].mxu1 }
 0x2da   :  { %v1652_v51 = vadd.f32 %v1651_v49, %v1650_v48  ;;  %v1653_v53 = vpop.f32.mrb[10].mxu1 }
 0x2db   :  { %v1654_v54 = vpop.f32.mrb[11].mxu1 }
 0x2dc   :  { %v1398_v3 = vadd.f32 %v1652_v51, %v1564_v55 }
 0x2f8   :  { %v1437_v9 = vpop.f32.mrb[12].mxu1 }
 0x2f9   :  { %v1438_v56 = vadd.f32 %v1437_v9, %v1398_v3  ;;  %v1683_v58 = vpop.f32.mrb[13].mxu1 }
 0x2fa   :  { %v1440_v59 = vpop.f32.mrb[14].mxu1 }
 0x2fb   :  { %v1589_v4 = vmul.f32 -1.442695, %v1438_v56  ;;  %v1684_v31 = vpop.f32.mrb[15].mxu1 }
 0x2fd   :  { %1871 = vpow2.f32 %v1589_v4 }
 0x307   :  { %v1872_v5 = vpop.eup %1871 }
 0x308   :  { %v1446_v6 = vadd.f32 1.0, %v1872_v5 }
 0x30a   :  { %1873 = vrcp.f32 %v1446_v6 }
 0x314   :  { %v1874_v10 = vpop.eup %1873 }
 0x315   :  { %v1449_v60 = vmul.f32 2.0, %v1874_v10 }
 0x317   :  { %1450 = vst [vmem:[#allocation10] sm:$0xff] %v1449_v60 }
 0x318   :  { %1974 = shalt.err (!%p1971_p8)
}
 0x319   :  { %s1975_s11 = scalar_lea.hbm %s2277_s7, 128 }
 0x31a   :  { %p1976_p9 = scmp.ne.s32.totalorder %s2277_s7, %s1975_s11  ;;  %p1979_p10 = scmp.lt.u32.totalorder %s1975_s11, %s2277_s7 }
 0x31c   :  { %p1981_p11 = pnand %p1979_p10, %p1976_p9 }
 0x31e   :  { %1984 = shalt.err (!%p1981_p11)
}
 0x31f   :  { %1460 = dma.vmem_to_hbm [thread:$0]  %s1458_s8, 128, %s2277_s7, [#allocation4]  }
 0x320   :  { %1991 = dma.done.wait [#allocation4], 128  }
 0x321   :  { %1992 = vsyncadd [#allocation4], 4294967168 }
 0x322   :  { %1464 = vsyncpa [#allocation3], 1 }
 0x323   :  { %1465 = vsyncpa [#allocation6], 1 }
 0x324   :  { %1466 = vsyncpa [#allocation9], 1 }
 0x325   :  { %1467 = vsyncpa [#allocation4], 1 }

</bundles_post_ra>
